<compile_context>
chip_gen: v6e
topology: v6e:2x2x1
jax: 0.10.0
libtpu: 0.0.40
codegen_flags: <defaults>
</compile_context>

<pallas_src>
import functools

import jax
import jax.numpy as jnp
from jax.experimental import pallas as pl
from jax.experimental.pallas import tpu as pltpu


# ----------------------------------------------------------------------------
# Fused kernel
# ----------------------------------------------------------------------------
def cnn_encoder_fused_kernel(*refs, filter_sizes, b_tile, seq_len, num_filters):
    """Fused conv branches + max-pool + fc head for one batch tile.

    refs layout (n = len(filter_sizes)):
      refs[0]           : emb      (b_tile, L, E)  f32
      refs[1 .. n]      : conv_w_i (fs_i, E, F)    tap-major conv weights
      refs[1+n .. 2n]   : conv_b_i (1, F)
      refs[1+2n]        : fc_w     (n*F, H)        already transposed
      refs[2+2n]        : fc_b     (1, H)
      refs[3+2n]        : out      (b_tile, 1, H)
    """
    n = len(filter_sizes)
    emb_ref = refs[0]
    conv_w_refs = refs[1:1 + n]
    conv_b_refs = refs[1 + n:1 + 2 * n]
    fcw_ref = refs[1 + 2 * n]
    fcb_ref = refs[2 + 2 * n]
    out_ref = refs[3 + 2 * n]

    L, F = seq_len, num_filters
    E = emb_ref.shape[-1]

    # Flatten the batch tile into the matmul M dimension (layout-free collapse
    # of the leading dims; L is a multiple of the sublane count here).
    emb2d = emb_ref[...].reshape(b_tile * L, E)                   # (b_tile*L, E)

    feats = []
    for fs, w_ref, b_ref in zip(filter_sizes, conv_w_refs, conv_b_refs):
        l_out = L - fs + 1
        # Conv1d = sum over taps of a time-shifted full-length matmul.
        acc = None
        for k in range(fs):                                       # static unroll
            y = jnp.dot(emb2d, w_ref[k],
                        preferred_element_type=jnp.float32)       # (b_tile*L, F)
            piece = y.reshape(b_tile, L, F)[:, k:k + l_out, :]    # (b_tile,l_out,F)
            acc = piece if acc is None else acc + piece
        h = jnp.tanh(acc + b_ref[...])                            # (b_tile,l_out,F)
        # Max-pool over time.  l_out is tiny here, so an unrolled max of 2-D
        # slices is used (for large L switch to jnp.max(h, axis=1)).
        pooled = h[:, 0, :]
        for t in range(1, l_out):
            pooled = jnp.maximum(pooled, h[:, t, :])
        feats.append(pooled)                                      # (b_tile, F)

    # fc head: Dropout (identity at inference) -> Linear -> Tanh.
    # Linear over concat(feats) == sum of per-branch blocks of the fc weight,
    # which keeps everything in VMEM/vregs and avoids an in-kernel lane concat.
    fc_w = fcw_ref[...]                                           # (n*F, H)
    out = jnp.zeros((b_tile, fc_w.shape[-1]), jnp.float32) + fcb_ref[...]
    for i, f in enumerate(feats):
        out = out + jnp.dot(f, fc_w[i * F:(i + 1) * F, :],
                            preferred_element_type=jnp.float32)
    out_ref[...] = jnp.tanh(out).reshape(b_tile, 1, -1).astype(out_ref.dtype)


# ----------------------------------------------------------------------------
# Parameter prep (done ONCE, outside the forward pass)
# ----------------------------------------------------------------------------
def prepare_params(raw, filter_sizes):
    """Repack PyTorch-layout parameters into kernel layout once."""
    del filter_sizes  # layout is implied by the conv weight shapes
    return {
        "emb": raw["emb"],
        # Conv1d weight (F, E, fs) -> tap-major (fs, E, F).
        "conv_w": [jnp.transpose(w, (2, 1, 0)) for w in raw["conv_w"]],
        "conv_b": [b.reshape(1, -1) for b in raw["conv_b"]],
        # Linear weight (H, fc_dim) -> (fc_dim, H).
        "fc_w": jnp.transpose(raw["fc_w"]),
        "fc_b": raw["fc_b"].reshape(1, -1),
    }


# ----------------------------------------------------------------------------
# Forward wrapper (single pallas_call)
# ----------------------------------------------------------------------------
def cnn_encoder_forward(x, prepped, filter_sizes, *, b_tile=None):
    """x: (B, L) int32 token ids.  Returns (B, hidden_dim) f32."""
    # Embedding gather stays in XLA (tiny here).
    # TODO(synk): at production (B, L), fuse the gather into the kernel via
    # PrefetchScalarGridSpec + pl.Element row gather to halve HBM traffic, and
    # feed the MXU bf16 operands (keep f32 accumulation) on v6e/v7x.
    emb = jnp.take(prepped["emb"], x, axis=0).astype(jnp.float32)  # (B, L, E)
    B, L, E = emb.shape
    F = prepped["conv_w"][0].shape[-1]
    H = prepped["fc_w"].shape[-1]

    if b_tile is None:
        # >= 2 grid steps when B >= 2 (feeds both v7x TensorCores); cap the
        # slab so (b_tile, L, E) stays comfortably inside VMEM at larger B.
        b_tile = 1 if B <= 1 else min(pl.cdiv(B, 2), 128)
    grid_b = pl.cdiv(B, b_tile)
    b_pad = grid_b * b_tile
    if b_pad != B:
        emb = jnp.pad(emb, ((0, b_pad - B), (0, 0), (0, 0)))

    kernel = functools.partial(
        cnn_encoder_fused_kernel,
        filter_sizes=tuple(filter_sizes), b_tile=b_tile,
        seq_len=L, num_filters=F)

    in_specs = [pl.BlockSpec((b_tile, L, E), lambda i: (i, 0, 0))]
    in_specs += [pl.BlockSpec(w.shape, lambda i: (0, 0, 0))
                 for w in prepped["conv_w"]]
    in_specs += [pl.BlockSpec(b.shape, lambda i: (0, 0))
                 for b in prepped["conv_b"]]
    in_specs += [pl.BlockSpec(prepped["fc_w"].shape, lambda i: (0, 0)),
                 pl.BlockSpec(prepped["fc_b"].shape, lambda i: (0, 0))]

    out = pl.pallas_call(
        kernel,
        out_shape=jax.ShapeDtypeStruct((b_pad, 1, H), jnp.float32),
        grid=(grid_b,),
        in_specs=in_specs,
        out_specs=pl.BlockSpec((b_tile, 1, H), lambda i: (i, 0, 0)),
        compiler_params=pltpu.CompilerParams(
            dimension_semantics=("parallel",)),
    )(emb, *prepped["conv_w"], *prepped["conv_b"],
      prepped["fc_w"], prepped["fc_b"])

    out = out.reshape(b_pad, H)
    return out if b_pad == B else out[:B]


# ----------------------------------------------------------------------------
# Pure-JAX reference (for correctness check)
# ----------------------------------------------------------------------------
def reference_forward(x, params, filter_sizes):
    emb = jnp.take(params["emb"], x, axis=0)            # (B, L, E)
    B, L, E = emb.shape
    feats = []
    for fs, w, b in zip(filter_sizes, params["conv_w"], params["conv_b"]):
        l_out = L - fs + 1
        acc = jnp.zeros((B, l_out, w.shape[0]), jnp.float32)
        for k in range(fs):
            acc = acc + jnp.einsum("ble,fe->blf", emb[:, k:k + l_out, :], w[:, :, k])
        h = jnp.tanh(acc + b[None, None, :])
        feats.append(jnp.max(h, axis=1))                # (B, F)
    h = jnp.concatenate(feats, axis=1)
    return jnp.tanh(h @ params["fc_w"].T + params["fc_b"][None, :])


# ----------------------------------------------------------------------------
# Main
# ----------------------------------------------------------------------------
if __name__ == "__main__":
    # Hyperparameters (small, consistent with the PyTorch module)
    vocab_size = 20
    embed_dim = 32
    filter_sizes = (2, 3, 4)
    num_filters = 16
    hidden_dim = 32
    B, L = 2, 8
    fc_dim = num_filters * len(filter_sizes)

    key = jax.random.PRNGKey(0)
    k_emb, k_x, k_fc, *k_convs = jax.random.split(key, 3 + len(filter_sizes))

    # Embedding table (vocab_size + 1, embed_dim); row 0 is the padding index.
    emb_table = 0.5 * jax.random.normal(k_emb, (vocab_size + 1, embed_dim),
                                        jnp.float32)
    emb_table = emb_table.at[0].set(0.0)

    conv_w, conv_b = [], []
    for fs, kc in zip(filter_sizes, k_convs):
        kw, kb = jax.random.split(kc)
        conv_w.append(0.3 * jax.random.normal(kw, (num_filters, embed_dim, fs),
                                              jnp.float32))
        conv_b.append(0.1 * jax.random.normal(kb, (num_filters,), jnp.float32))

    kfw, kfb = jax.random.split(k_fc)
    fc_w = 0.2 * jax.random.normal(kfw, (hidden_dim, fc_dim), jnp.float32)
    fc_b = 0.1 * jax.random.normal(kfb, (hidden_dim,), jnp.float32)

    raw_params = {"emb": emb_table, "conv_w": conv_w, "conv_b": conv_b,
                  "fc_w": fc_w, "fc_b": fc_b}
    prepped = prepare_params(raw_params, filter_sizes)

    # Token ids in [1, vocab_size], with a couple of padding (0) tokens.
    x = jax.random.randint(k_x, (B, L), 1, vocab_size + 1, jnp.int32)
    x = x.at[0, -2:].set(0)

    out = jax.block_until_ready(cnn_encoder_forward(x, prepped, filter_sizes))
    ref = jax.block_until_ready(reference_forward(x, raw_params, filter_sizes))

    assert out.shape == (B, hidden_dim)
    assert jnp.allclose(out, ref, rtol=2e-2, atol=2e-2), "mismatch vs reference"

    print("KERNEL_OK")
</pallas_src>

<mosaic_0001>
module attributes {stable_mosaic.version = 11 : i64} {
  func.func @cnn_encoder_fused_kernel(%arg0: i32, %arg1: memref<1x8x32xf32, #tpu.memory_space<vmem>>, %arg2: memref<2x32x16xf32, #tpu.memory_space<vmem>>, %arg3: memref<3x32x16xf32, #tpu.memory_space<vmem>>, %arg4: memref<4x32x16xf32, #tpu.memory_space<vmem>>, %arg5: memref<1x16xf32, #tpu.memory_space<vmem>>, %arg6: memref<1x16xf32, #tpu.memory_space<vmem>>, %arg7: memref<1x16xf32, #tpu.memory_space<vmem>>, %arg8: memref<48x32xf32, #tpu.memory_space<vmem>>, %arg9: memref<1x32xf32, #tpu.memory_space<vmem>>, %arg10: memref<1x1x32xf32, #tpu.memory_space<vmem>>) attributes {dimension_semantics = [#tpu.dimension_semantics<parallel>], iteration_bounds = array<i64: 2>, scalar_prefetch = 0 : i64, scratch_operands = 0 : i64, tpu.core_type = #tpu.core_type<tc>, window_params = [{transform_indices = @transform_0, window_bounds = array<i64: 1, 8, 32>}, {pipeline_mode = #tpu.pipeline_mode<synchronous>, transform_indices = @transform_1, window_bounds = array<i64: 2, 32, 16>}, {pipeline_mode = #tpu.pipeline_mode<synchronous>, transform_indices = @transform_2, window_bounds = array<i64: 3, 32, 16>}, {pipeline_mode = #tpu.pipeline_mode<synchronous>, transform_indices = @transform_3, window_bounds = array<i64: 4, 32, 16>}, {pipeline_mode = #tpu.pipeline_mode<synchronous>, transform_indices = @transform_4, window_bounds = array<i64: 1, 16>}, {pipeline_mode = #tpu.pipeline_mode<synchronous>, transform_indices = @transform_5, window_bounds = array<i64: 1, 16>}, {pipeline_mode = #tpu.pipeline_mode<synchronous>, transform_indices = @transform_6, window_bounds = array<i64: 1, 16>}, {pipeline_mode = #tpu.pipeline_mode<synchronous>, transform_indices = @transform_7, window_bounds = array<i64: 48, 32>}, {pipeline_mode = #tpu.pipeline_mode<synchronous>, transform_indices = @transform_8, window_bounds = array<i64: 1, 32>}, {transform_indices = @transform_9, window_bounds = array<i64: 1, 1, 32>}]} {
    %c0 = arith.constant 0 : index
    %c0_0 = arith.constant 0 : index
    %c0_1 = arith.constant 0 : index
    %0 = vector.load %arg1[%c0, %c0_0, %c0_1] : memref<1x8x32xf32, #tpu.memory_space<vmem>>, vector<1x8x32xf32>
    %1 = vector.shape_cast %0 : vector<1x8x32xf32> to vector<8x32xf32>
    %c0_2 = arith.constant 0 : index
    %c0_3 = arith.constant 0 : index
    %c0_4 = arith.constant 0 : index
    %2 = vector.load %arg2[%c0_2, %c0_3, %c0_4] : memref<2x32x16xf32, #tpu.memory_space<vmem>>, vector<1x32x16xf32>
    %3 = vector.shape_cast %2 : vector<1x32x16xf32> to vector<32x16xf32>
    %cst = arith.constant dense<0.000000e+00> : vector<8x16xf32>
    %4 = tpu.matmul %1, %3, %cst {dimension_numbers = #tpu.dot_dimension_numbers<[1], [0], [0], [1], [0, 0, 1, 1], [], []>} : vector<8x32xf32>, vector<32x16xf32>, vector<8x16xf32> -> vector<8x16xf32>
    %5 = vector.shape_cast %4 : vector<8x16xf32> to vector<1x8x16xf32>
    %6 = vector.extract_strided_slice %5 {offsets = [0, 0, 0], sizes = [1, 7, 16], strides = [1, 1, 1]} : vector<1x8x16xf32> to vector<1x7x16xf32>
    %c1 = arith.constant 1 : index
    %c0_5 = arith.constant 0 : index
    %c0_6 = arith.constant 0 : index
    %7 = vector.load %arg2[%c1, %c0_5, %c0_6] : memref<2x32x16xf32, #tpu.memory_space<vmem>>, vector<1x32x16xf32>
    %8 = vector.shape_cast %7 : vector<1x32x16xf32> to vector<32x16xf32>
    %cst_7 = arith.constant dense<0.000000e+00> : vector<8x16xf32>
    %9 = tpu.matmul %1, %8, %cst_7 {dimension_numbers = #tpu.dot_dimension_numbers<[1], [0], [0], [1], [0, 0, 1, 1], [], []>} : vector<8x32xf32>, vector<32x16xf32>, vector<8x16xf32> -> vector<8x16xf32>
    %10 = vector.shape_cast %9 : vector<8x16xf32> to vector<1x8x16xf32>
    %11 = vector.extract_strided_slice %10 {offsets = [0, 1, 0], sizes = [1, 7, 16], strides = [1, 1, 1]} : vector<1x8x16xf32> to vector<1x7x16xf32>
    %12 = arith.addf %6, %11 : vector<1x7x16xf32>
    %c0_8 = arith.constant 0 : index
    %c0_9 = arith.constant 0 : index
    %13 = vector.load %arg5[%c0_8, %c0_9] : memref<1x16xf32, #tpu.memory_space<vmem>>, vector<1x16xf32>
    %14 = vector.shape_cast %13 : vector<1x16xf32> to vector<1x1x16xf32>
    %15 = vector.broadcast %14 : vector<1x1x16xf32> to vector<1x7x16xf32>
    %16 = arith.addf %12, %15 : vector<1x7x16xf32>
    %17 = math.tanh %16 : vector<1x7x16xf32>
    %18 = vector.extract_strided_slice %17 {offsets = [0, 0, 0], sizes = [1, 1, 16], strides = [1, 1, 1]} : vector<1x7x16xf32> to vector<1x1x16xf32>
    %19 = vector.shape_cast %18 : vector<1x1x16xf32> to vector<1x16xf32>
    %20 = vector.extract_strided_slice %17 {offsets = [0, 1, 0], sizes = [1, 1, 16], strides = [1, 1, 1]} : vector<1x7x16xf32> to vector<1x1x16xf32>
    %21 = vector.shape_cast %20 : vector<1x1x16xf32> to vector<1x16xf32>
    %22 = arith.maximumf %19, %21 : vector<1x16xf32>
    %23 = vector.extract_strided_slice %17 {offsets = [0, 2, 0], sizes = [1, 1, 16], strides = [1, 1, 1]} : vector<1x7x16xf32> to vector<1x1x16xf32>
    %24 = vector.shape_cast %23 : vector<1x1x16xf32> to vector<1x16xf32>
    %25 = arith.maximumf %22, %24 : vector<1x16xf32>
    %26 = vector.extract_strided_slice %17 {offsets = [0, 3, 0], sizes = [1, 1, 16], strides = [1, 1, 1]} : vector<1x7x16xf32> to vector<1x1x16xf32>
    %27 = vector.shape_cast %26 : vector<1x1x16xf32> to vector<1x16xf32>
    %28 = arith.maximumf %25, %27 : vector<1x16xf32>
    %29 = vector.extract_strided_slice %17 {offsets = [0, 4, 0], sizes = [1, 1, 16], strides = [1, 1, 1]} : vector<1x7x16xf32> to vector<1x1x16xf32>
    %30 = vector.shape_cast %29 : vector<1x1x16xf32> to vector<1x16xf32>
    %31 = arith.maximumf %28, %30 : vector<1x16xf32>
    %32 = vector.extract_strided_slice %17 {offsets = [0, 5, 0], sizes = [1, 1, 16], strides = [1, 1, 1]} : vector<1x7x16xf32> to vector<1x1x16xf32>
    %33 = vector.shape_cast %32 : vector<1x1x16xf32> to vector<1x16xf32>
    %34 = arith.maximumf %31, %33 : vector<1x16xf32>
    %35 = vector.extract_strided_slice %17 {offsets = [0, 6, 0], sizes = [1, 1, 16], strides = [1, 1, 1]} : vector<1x7x16xf32> to vector<1x1x16xf32>
    %36 = vector.shape_cast %35 : vector<1x1x16xf32> to vector<1x16xf32>
    %37 = arith.maximumf %34, %36 : vector<1x16xf32>
    %c0_10 = arith.constant 0 : index
    %c0_11 = arith.constant 0 : index
    %c0_12 = arith.constant 0 : index
    %38 = vector.load %arg3[%c0_10, %c0_11, %c0_12] : memref<3x32x16xf32, #tpu.memory_space<vmem>>, vector<1x32x16xf32>
    %39 = vector.shape_cast %38 : vector<1x32x16xf32> to vector<32x16xf32>
    %cst_13 = arith.constant dense<0.000000e+00> : vector<8x16xf32>
    %40 = tpu.matmul %1, %39, %cst_13 {dimension_numbers = #tpu.dot_dimension_numbers<[1], [0], [0], [1], [0, 0, 1, 1], [], []>} : vector<8x32xf32>, vector<32x16xf32>, vector<8x16xf32> -> vector<8x16xf32>
    %41 = vector.shape_cast %40 : vector<8x16xf32> to vector<1x8x16xf32>
    %42 = vector.extract_strided_slice %41 {offsets = [0, 0, 0], sizes = [1, 6, 16], strides = [1, 1, 1]} : vector<1x8x16xf32> to vector<1x6x16xf32>
    %c1_14 = arith.constant 1 : index
    %c0_15 = arith.constant 0 : index
    %c0_16 = arith.constant 0 : index
    %43 = vector.load %arg3[%c1_14, %c0_15, %c0_16] : memref<3x32x16xf32, #tpu.memory_space<vmem>>, vector<1x32x16xf32>
    %44 = vector.shape_cast %43 : vector<1x32x16xf32> to vector<32x16xf32>
    %cst_17 = arith.constant dense<0.000000e+00> : vector<8x16xf32>
    %45 = tpu.matmul %1, %44, %cst_17 {dimension_numbers = #tpu.dot_dimension_numbers<[1], [0], [0], [1], [0, 0, 1, 1], [], []>} : vector<8x32xf32>, vector<32x16xf32>, vector<8x16xf32> -> vector<8x16xf32>
    %46 = vector.shape_cast %45 : vector<8x16xf32> to vector<1x8x16xf32>
    %47 = vector.extract_strided_slice %46 {offsets = [0, 1, 0], sizes = [1, 6, 16], strides = [1, 1, 1]} : vector<1x8x16xf32> to vector<1x6x16xf32>
    %48 = arith.addf %42, %47 : vector<1x6x16xf32>
    %c2 = arith.constant 2 : index
    %c0_18 = arith.constant 0 : index
    %c0_19 = arith.constant 0 : index
    %49 = vector.load %arg3[%c2, %c0_18, %c0_19] : memref<3x32x16xf32, #tpu.memory_space<vmem>>, vector<1x32x16xf32>
    %50 = vector.shape_cast %49 : vector<1x32x16xf32> to vector<32x16xf32>
    %cst_20 = arith.constant dense<0.000000e+00> : vector<8x16xf32>
    %51 = tpu.matmul %1, %50, %cst_20 {dimension_numbers = #tpu.dot_dimension_numbers<[1], [0], [0], [1], [0, 0, 1, 1], [], []>} : vector<8x32xf32>, vector<32x16xf32>, vector<8x16xf32> -> vector<8x16xf32>
    %52 = vector.shape_cast %51 : vector<8x16xf32> to vector<1x8x16xf32>
    %53 = vector.extract_strided_slice %52 {offsets = [0, 2, 0], sizes = [1, 6, 16], strides = [1, 1, 1]} : vector<1x8x16xf32> to vector<1x6x16xf32>
    %54 = arith.addf %48, %53 : vector<1x6x16xf32>
    %c0_21 = arith.constant 0 : index
    %c0_22 = arith.constant 0 : index
    %55 = vector.load %arg6[%c0_21, %c0_22] : memref<1x16xf32, #tpu.memory_space<vmem>>, vector<1x16xf32>
    %56 = vector.shape_cast %55 : vector<1x16xf32> to vector<1x1x16xf32>
    %57 = vector.broadcast %56 : vector<1x1x16xf32> to vector<1x6x16xf32>
    %58 = arith.addf %54, %57 : vector<1x6x16xf32>
    %59 = math.tanh %58 : vector<1x6x16xf32>
    %60 = vector.extract_strided_slice %59 {offsets = [0, 0, 0], sizes = [1, 1, 16], strides = [1, 1, 1]} : vector<1x6x16xf32> to vector<1x1x16xf32>
    %61 = vector.shape_cast %60 : vector<1x1x16xf32> to vector<1x16xf32>
    %62 = vector.extract_strided_slice %59 {offsets = [0, 1, 0], sizes = [1, 1, 16], strides = [1, 1, 1]} : vector<1x6x16xf32> to vector<1x1x16xf32>
    %63 = vector.shape_cast %62 : vector<1x1x16xf32> to vector<1x16xf32>
    %64 = arith.maximumf %61, %63 : vector<1x16xf32>
    %65 = vector.extract_strided_slice %59 {offsets = [0, 2, 0], sizes = [1, 1, 16], strides = [1, 1, 1]} : vector<1x6x16xf32> to vector<1x1x16xf32>
    %66 = vector.shape_cast %65 : vector<1x1x16xf32> to vector<1x16xf32>
    %67 = arith.maximumf %64, %66 : vector<1x16xf32>
    %68 = vector.extract_strided_slice %59 {offsets = [0, 3, 0], sizes = [1, 1, 16], strides = [1, 1, 1]} : vector<1x6x16xf32> to vector<1x1x16xf32>
    %69 = vector.shape_cast %68 : vector<1x1x16xf32> to vector<1x16xf32>
    %70 = arith.maximumf %67, %69 : vector<1x16xf32>
    %71 = vector.extract_strided_slice %59 {offsets = [0, 4, 0], sizes = [1, 1, 16], strides = [1, 1, 1]} : vector<1x6x16xf32> to vector<1x1x16xf32>
    %72 = vector.shape_cast %71 : vector<1x1x16xf32> to vector<1x16xf32>
    %73 = arith.maximumf %70, %72 : vector<1x16xf32>
    %74 = vector.extract_strided_slice %59 {offsets = [0, 5, 0], sizes = [1, 1, 16], strides = [1, 1, 1]} : vector<1x6x16xf32> to vector<1x1x16xf32>
    %75 = vector.shape_cast %74 : vector<1x1x16xf32> to vector<1x16xf32>
    %76 = arith.maximumf %73, %75 : vector<1x16xf32>
    %c0_23 = arith.constant 0 : index
    %c0_24 = arith.constant 0 : index
    %c0_25 = arith.constant 0 : index
    %77 = vector.load %arg4[%c0_23, %c0_24, %c0_25] : memref<4x32x16xf32, #tpu.memory_space<vmem>>, vector<1x32x16xf32>
    %78 = vector.shape_cast %77 : vector<1x32x16xf32> to vector<32x16xf32>
    %cst_26 = arith.constant dense<0.000000e+00> : vector<8x16xf32>
    %79 = tpu.matmul %1, %78, %cst_26 {dimension_numbers = #tpu.dot_dimension_numbers<[1], [0], [0], [1], [0, 0, 1, 1], [], []>} : vector<8x32xf32>, vector<32x16xf32>, vector<8x16xf32> -> vector<8x16xf32>
    %80 = vector.shape_cast %79 : vector<8x16xf32> to vector<1x8x16xf32>
    %81 = vector.extract_strided_slice %80 {offsets = [0, 0, 0], sizes = [1, 5, 16], strides = [1, 1, 1]} : vector<1x8x16xf32> to vector<1x5x16xf32>
    %c1_27 = arith.constant 1 : index
    %c0_28 = arith.constant 0 : index
    %c0_29 = arith.constant 0 : index
    %82 = vector.load %arg4[%c1_27, %c0_28, %c0_29] : memref<4x32x16xf32, #tpu.memory_space<vmem>>, vector<1x32x16xf32>
    %83 = vector.shape_cast %82 : vector<1x32x16xf32> to vector<32x16xf32>
    %cst_30 = arith.constant dense<0.000000e+00> : vector<8x16xf32>
    %84 = tpu.matmul %1, %83, %cst_30 {dimension_numbers = #tpu.dot_dimension_numbers<[1], [0], [0], [1], [0, 0, 1, 1], [], []>} : vector<8x32xf32>, vector<32x16xf32>, vector<8x16xf32> -> vector<8x16xf32>
    %85 = vector.shape_cast %84 : vector<8x16xf32> to vector<1x8x16xf32>
    %86 = vector.extract_strided_slice %85 {offsets = [0, 1, 0], sizes = [1, 5, 16], strides = [1, 1, 1]} : vector<1x8x16xf32> to vector<1x5x16xf32>
    %87 = arith.addf %81, %86 : vector<1x5x16xf32>
    %c2_31 = arith.constant 2 : index
    %c0_32 = arith.constant 0 : index
    %c0_33 = arith.constant 0 : index
    %88 = vector.load %arg4[%c2_31, %c0_32, %c0_33] : memref<4x32x16xf32, #tpu.memory_space<vmem>>, vector<1x32x16xf32>
    %89 = vector.shape_cast %88 : vector<1x32x16xf32> to vector<32x16xf32>
    %cst_34 = arith.constant dense<0.000000e+00> : vector<8x16xf32>
    %90 = tpu.matmul %1, %89, %cst_34 {dimension_numbers = #tpu.dot_dimension_numbers<[1], [0], [0], [1], [0, 0, 1, 1], [], []>} : vector<8x32xf32>, vector<32x16xf32>, vector<8x16xf32> -> vector<8x16xf32>
    %91 = vector.shape_cast %90 : vector<8x16xf32> to vector<1x8x16xf32>
    %92 = vector.extract_strided_slice %91 {offsets = [0, 2, 0], sizes = [1, 5, 16], strides = [1, 1, 1]} : vector<1x8x16xf32> to vector<1x5x16xf32>
    %93 = arith.addf %87, %92 : vector<1x5x16xf32>
    %c3 = arith.constant 3 : index
    %c0_35 = arith.constant 0 : index
    %c0_36 = arith.constant 0 : index
    %94 = vector.load %arg4[%c3, %c0_35, %c0_36] : memref<4x32x16xf32, #tpu.memory_space<vmem>>, vector<1x32x16xf32>
    %95 = vector.shape_cast %94 : vector<1x32x16xf32> to vector<32x16xf32>
    %cst_37 = arith.constant dense<0.000000e+00> : vector<8x16xf32>
    %96 = tpu.matmul %1, %95, %cst_37 {dimension_numbers = #tpu.dot_dimension_numbers<[1], [0], [0], [1], [0, 0, 1, 1], [], []>} : vector<8x32xf32>, vector<32x16xf32>, vector<8x16xf32> -> vector<8x16xf32>
    %97 = vector.shape_cast %96 : vector<8x16xf32> to vector<1x8x16xf32>
    %98 = vector.extract_strided_slice %97 {offsets = [0, 3, 0], sizes = [1, 5, 16], strides = [1, 1, 1]} : vector<1x8x16xf32> to vector<1x5x16xf32>
    %99 = arith.addf %93, %98 : vector<1x5x16xf32>
    %c0_38 = arith.constant 0 : index
    %c0_39 = arith.constant 0 : index
    %100 = vector.load %arg7[%c0_38, %c0_39] : memref<1x16xf32, #tpu.memory_space<vmem>>, vector<1x16xf32>
    %101 = vector.shape_cast %100 : vector<1x16xf32> to vector<1x1x16xf32>
    %102 = vector.broadcast %101 : vector<1x1x16xf32> to vector<1x5x16xf32>
    %103 = arith.addf %99, %102 : vector<1x5x16xf32>
    %104 = math.tanh %103 : vector<1x5x16xf32>
    %105 = vector.extract_strided_slice %104 {offsets = [0, 0, 0], sizes = [1, 1, 16], strides = [1, 1, 1]} : vector<1x5x16xf32> to vector<1x1x16xf32>
    %106 = vector.shape_cast %105 : vector<1x1x16xf32> to vector<1x16xf32>
    %107 = vector.extract_strided_slice %104 {offsets = [0, 1, 0], sizes = [1, 1, 16], strides = [1, 1, 1]} : vector<1x5x16xf32> to vector<1x1x16xf32>
    %108 = vector.shape_cast %107 : vector<1x1x16xf32> to vector<1x16xf32>
    %109 = arith.maximumf %106, %108 : vector<1x16xf32>
    %110 = vector.extract_strided_slice %104 {offsets = [0, 2, 0], sizes = [1, 1, 16], strides = [1, 1, 1]} : vector<1x5x16xf32> to vector<1x1x16xf32>
    %111 = vector.shape_cast %110 : vector<1x1x16xf32> to vector<1x16xf32>
    %112 = arith.maximumf %109, %111 : vector<1x16xf32>
    %113 = vector.extract_strided_slice %104 {offsets = [0, 3, 0], sizes = [1, 1, 16], strides = [1, 1, 1]} : vector<1x5x16xf32> to vector<1x1x16xf32>
    %114 = vector.shape_cast %113 : vector<1x1x16xf32> to vector<1x16xf32>
    %115 = arith.maximumf %112, %114 : vector<1x16xf32>
    %116 = vector.extract_strided_slice %104 {offsets = [0, 4, 0], sizes = [1, 1, 16], strides = [1, 1, 1]} : vector<1x5x16xf32> to vector<1x1x16xf32>
    %117 = vector.shape_cast %116 : vector<1x1x16xf32> to vector<1x16xf32>
    %118 = arith.maximumf %115, %117 : vector<1x16xf32>
    %c0_40 = arith.constant 0 : index
    %c0_41 = arith.constant 0 : index
    %119 = vector.load %arg8[%c0_40, %c0_41] : memref<48x32xf32, #tpu.memory_space<vmem>>, vector<48x32xf32>
    %cst_42 = arith.constant 0.000000e+00 : f32
    %120 = vector.broadcast %cst_42 : f32 to vector<1x32xf32>
    %c0_43 = arith.constant 0 : index
    %c0_44 = arith.constant 0 : index
    %121 = vector.load %arg9[%c0_43, %c0_44] : memref<1x32xf32, #tpu.memory_space<vmem>>, vector<1x32xf32>
    %122 = arith.addf %120, %121 : vector<1x32xf32>
    %123 = vector.extract_strided_slice %119 {offsets = [0, 0], sizes = [16, 32], strides = [1, 1]} : vector<48x32xf32> to vector<16x32xf32>
    %cst_45 = arith.constant dense<0.000000e+00> : vector<1x32xf32>
    %124 = tpu.matmul %37, %123, %cst_45 {dimension_numbers = #tpu.dot_dimension_numbers<[1], [0], [0], [1], [0, 0, 1, 1], [], []>} : vector<1x16xf32>, vector<16x32xf32>, vector<1x32xf32> -> vector<1x32xf32>
    %125 = arith.addf %122, %124 : vector<1x32xf32>
    %126 = vector.extract_strided_slice %119 {offsets = [16, 0], sizes = [16, 32], strides = [1, 1]} : vector<48x32xf32> to vector<16x32xf32>
    %cst_46 = arith.constant dense<0.000000e+00> : vector<1x32xf32>
    %127 = tpu.matmul %76, %126, %cst_46 {dimension_numbers = #tpu.dot_dimension_numbers<[1], [0], [0], [1], [0, 0, 1, 1], [], []>} : vector<1x16xf32>, vector<16x32xf32>, vector<1x32xf32> -> vector<1x32xf32>
    %128 = arith.addf %125, %127 : vector<1x32xf32>
    %129 = vector.extract_strided_slice %119 {offsets = [32, 0], sizes = [16, 32], strides = [1, 1]} : vector<48x32xf32> to vector<16x32xf32>
    %cst_47 = arith.constant dense<0.000000e+00> : vector<1x32xf32>
    %130 = tpu.matmul %118, %129, %cst_47 {dimension_numbers = #tpu.dot_dimension_numbers<[1], [0], [0], [1], [0, 0, 1, 1], [], []>} : vector<1x16xf32>, vector<16x32xf32>, vector<1x32xf32> -> vector<1x32xf32>
    %131 = arith.addf %128, %130 : vector<1x32xf32>
    %132 = math.tanh %131 : vector<1x32xf32>
    %133 = vector.shape_cast %132 : vector<1x32xf32> to vector<1x1x32xf32>
    %c0_48 = arith.constant 0 : index
    %c0_49 = arith.constant 0 : index
    %c0_50 = arith.constant 0 : index
    %134 = vector.load %arg10[%c0_48, %c0_49, %c0_50] : memref<1x1x32xf32, #tpu.memory_space<vmem>>, vector<1x1x32xf32>
    tpu.vector_store %arg10[%c0_48, %c0_49, %c0_50], %133 {strides = array<i32>} : memref<1x1x32xf32, #tpu.memory_space<vmem>>, vector<1x1x32xf32>,
    return
  }
  func.func @transform_0(%arg0: i32) -> (i32, i32, i32) {
    %c0_i32 = arith.constant 0 : i32
    %c0_i32_0 = arith.constant 0 : i32
    %c0_i32_1 = arith.constant 0 : i32
    return %arg0, %c0_i32, %c0_i32_0 : i32, i32, i32
  }
  func.func @transform_1(%arg0: i32) -> (i32, i32, i32) {
    %c0_i32 = arith.constant 0 : i32
    %c0_i32_0 = arith.constant 0 : i32
    %c0_i32_1 = arith.constant 0 : i32
    %c0_i32_2 = arith.constant 0 : i32
    return %c0_i32, %c0_i32_0, %c0_i32_1 : i32, i32, i32
  }
  func.func @transform_2(%arg0: i32) -> (i32, i32, i32) {
    %c0_i32 = arith.constant 0 : i32
    %c0_i32_0 = arith.constant 0 : i32
    %c0_i32_1 = arith.constant 0 : i32
    %c0_i32_2 = arith.constant 0 : i32
    return %c0_i32, %c0_i32_0, %c0_i32_1 : i32, i32, i32
  }
  func.func @transform_3(%arg0: i32) -> (i32, i32, i32) {
    %c0_i32 = arith.constant 0 : i32
    %c0_i32_0 = arith.constant 0 : i32
    %c0_i32_1 = arith.constant 0 : i32
    %c0_i32_2 = arith.constant 0 : i32
    return %c0_i32, %c0_i32_0, %c0_i32_1 : i32, i32, i32
  }
  func.func @transform_4(%arg0: i32) -> (i32, i32) {
    %c0_i32 = arith.constant 0 : i32
    %c0_i32_0 = arith.constant 0 : i32
    %c0_i32_1 = arith.constant 0 : i32
    return %c0_i32, %c0_i32_0 : i32, i32
  }
  func.func @transform_5(%arg0: i32) -> (i32, i32) {
    %c0_i32 = arith.constant 0 : i32
    %c0_i32_0 = arith.constant 0 : i32
    %c0_i32_1 = arith.constant 0 : i32
    return %c0_i32, %c0_i32_0 : i32, i32
  }
  func.func @transform_6(%arg0: i32) -> (i32, i32) {
    %c0_i32 = arith.constant 0 : i32
    %c0_i32_0 = arith.constant 0 : i32
    %c0_i32_1 = arith.constant 0 : i32
    return %c0_i32, %c0_i32_0 : i32, i32
  }
  func.func @transform_7(%arg0: i32) -> (i32, i32) {
    %c0_i32 = arith.constant 0 : i32
    %c0_i32_0 = arith.constant 0 : i32
    %c0_i32_1 = arith.constant 0 : i32
    return %c0_i32, %c0_i32_0 : i32, i32
  }
  func.func @transform_8(%arg0: i32) -> (i32, i32) {
    %c0_i32 = arith.constant 0 : i32
    %c0_i32_0 = arith.constant 0 : i32
    %c0_i32_1 = arith.constant 0 : i32
    return %c0_i32, %c0_i32_0 : i32, i32
  }
  func.func @transform_9(%arg0: i32) -> (i32, i32, i32) {
    %c0_i32 = arith.constant 0 : i32
    %c0_i32_0 = arith.constant 0 : i32
    %c0_i32_1 = arith.constant 0 : i32
    return %arg0, %c0_i32, %c0_i32_0 : i32, i32, i32
  }
}

</mosaic_0001>

<bundles_post_ra>
// kernel: tpu_custom_call.1
= control target key start
LH: loop header
LB: loop body
LE: loop exit
PB: predicated region body
PF: predicated region fallthrough
CT: control target
= control target key end

     0   :  { %14 = vsyncpa [#allocation3], 0  ;;  %s2110_s0 = inlined_call_operand.vmem [shape: f32[2,8,32], index: 0, kind: input, shape index: {}]   ;;  %s2111_s1 = inlined_call_operand.vmem [shape: f32[2,32,16], index: 1, kind: input, shape index: {}]   ;;  %s2112_s2 = inlined_call_operand.vmem [shape: f32[3,32,16], index: 2, kind: input, shape index: {}]   ;;  %s2113_s3 = inlined_call_operand.vmem [shape: f32[4,32,16], index: 3, kind: input, shape index: {}]   ;;  %s2114_s4 = inlined_call_operand.vmem [shape: f32[1,16], index: 4, kind: input, shape index: {}]   ;;  %s2115_s5 = inlined_call_operand.vmem [shape: f32[1,16], index: 5, kind: input, shape index: {}]   ;;  %s2116_s6 = inlined_call_operand.vmem [shape: f32[1,16], index: 6, kind: input, shape index: {}]   ;;  %s2117_s7 = inlined_call_operand.vmem [shape: f32[48,32], index: 7, kind: input, shape index: {}]   ;;  %s2118_s8 = inlined_call_operand.vmem [shape: f32[1,32], index: 8, kind: input, shape index: {}]   ;;  %s2119_s9 = inlined_call_operand.hbm [shape: f32[2,1,32], index: 9, kind: output, shape index: {}]  }
   0x1   :  { %16 = vsyncpa [#allocation3 + $0x1], 0  ;;  %s1790_s30 = smov 0   ;;  %s1792_s10 = smov 0  }
   0x2   :  { %s1794_s11 = smov 0   ;;  %s1796_s12 = smov 0  }
   0x3 LB: > { %s1811_s13 = sadd.s32 4294967295, %s1735_s12   ;;  %s1405_s14 = sadd.s32 4294967294, %s1735_s12   ;;  %s1735_s12 = sphi %s1796_s12, %s2125_s12   ;;  %s1731_s11 = sphi %s1794_s11, %s2124_s11   ;;  %s1727_s10 = sphi %s1792_s10, %s2123_s10   ;;  %s1723_s30 = sphi %s1790_s30, %s2122_s30  }
   0x4   : > { %s1815_s15 = sadd.s32 1, %s1735_s12   ;;  %s223_s16 = sadd.s32 1, %s1731_s11 }
   0x5   : > { %s220_s17 = ssub.s32 %s1735_s12, %s1815_s15  ;;  %p233_p0 = scmp.ne.s32.totalorder %s1731_s11, %s1727_s10 }
   0x6   : > { %p221_p1 = scmp.eq.s32.totalorder %s220_s17, 0  ;;  %p234_p2 = scmp.eq.s32.totalorder %s1811_s13, 1 }
   0x7   : > { %p239_p3 = scmp.ne.s32.totalorder %s1727_s10, %s1723_s30  ;;  %p240_p4 = scmp.eq.s32.totalorder %s1405_s14, 1 }
   0x8   : > { %s1826_s18 = scalar_select %p221_p1, %s1731_s11, %s223_s16  }
   0x9   : > { %p1828_p5 = por %p234_p2, %p233_p0  ;;  %p1832_p6 = por %p240_p4, %p239_p3 }
   0xa   : > { %p1408_p7 = scmp.ge.s32.totalorder %s1735_s12, 1  ;;  %p289_p8 = scmp.lt.s32.totalorder %s1735_s12, 3 }
   0xc   : > { %p290_p9 = pnand %p1408_p7, %p289_p8 }
   0xd   : > { %p323_p10 = scmp.lt.s32.totalorder (!%p290_p9), %s1811_s13, 1  ;;  %s1449_s23 = sshll.u32 (!%p290_p9), %s1811_s13, 4 }
   0xe   : > { %293 = sbr.rel (%p290_p9) target bundleno = 512 (0x200), region = 56  ;;  %s2075_s28 = scalar_lea.hbm (!%p290_p9), %s2119_s9, %s1449_s23 }
   0xf   : > { %s1739_s16 = smov (!%p290_p9), [#allocation2]  }
  0x10   : > { %s1679_s17 = sshll.u32 (!%p290_p9), %s1739_s16, 4  ;;  %s1680_s17 = int_to_ptr.vmem [resolvable:$false] %s1679_s17 }
  0x13   : > { %v331_v0 = vld [vmem:[%s2111_s1 + $0x18] sm:$0xff]  ;;  %v1737_v2 = vmov 0.0   ;;  %v330_v3 = vld [vmem:[%s2111_s1 + $0x10] sm:$0xff]  ;;  %s324_s29 = scalar_select %p323_p10, %s1811_s13, 1  ;;  %v329_v5 = vld [vmem:[%s2111_s1 + $0x8] sm:$0xff]  ;;  %vm332_vm0 = vcmask 261120  }
  0x14   : > { %v1414_v1 = vld [vmem:[%s2111_s1 + $0x38] sm:$0xff]  ;;  %1506 = vmatprep.subr.mxu0 %v1737_v2  ;;  %1517 = vmatprep.subr.mxu1 %v1737_v2  ;;  %v1413_v4 = vld [vmem:[%s2111_s1 + $0x30] sm:$0xff]  ;;  %v1412_v6 = vld [vmem:[%s2111_s1 + $0x28] sm:$0xff]  ;;  %vm1738_vm1 = vmmov 0   ;;  %vm1111_vm2 = vcmask 130048   ;;  %vm1335_vm3 = vcmask 253952  }
  0x15   : > { %1507 = vmatpush3.msra.mxu0 %v331_v0  ;;  %1518 = vmatpush3.msra.mxu1 %v1414_v1  ;;  %s1409_s22 = sshll.u32 %s324_s29, 3  ;;  %v328_v7 = vld [vmem:[%s2111_s1] sm:$0xff]  ;;  %v516_v10 = vld [vmem:[%s2112_s2 + $0x18] sm:$0xff]  ;;  %v515_v12 = vld [vmem:[%s2112_s2 + $0x10] sm:$0xff]  ;;  %s1681_s13 = scalar_lea.vmem %s1680_s17, 32 }
  0x16   : > { %1508 = vmatprep.subr.mxu0 %v1737_v2  ;;  %1519 = vmatprep.subr.mxu1 %v1737_v2  ;;  %s326_s27 = scalar_lea.vmem %s2110_s0, %s1409_s22  ;;  %v1411_v8 = vld [vmem:[%s2111_s1 + $0x20] sm:$0xff]  ;;  %v1421_v11 = vld [vmem:[%s2112_s2 + $0x38] sm:$0xff]  ;;  %v1420_v13 = vld [vmem:[%s2112_s2 + $0x30] sm:$0xff]  ;;  %s321_s22 = sand.u32 1, %s1727_s10  }
  0x17   : > { %1509 = vmatpush3.msra.mxu0 %v330_v3  ;;  %1520 = vmatpush3.msra.mxu1 %v1413_v4  ;;  %v1875_v9 = vld [vmem:[%s326_s27] sm:$0xff]  ;;  %v514_v14 = vld [vmem:[%s2112_s2 + $0x8] sm:$0xff]  ;;  %v1426_v18 = vld [vmem:[%s2112_s2 + $0x58] sm:$0xff]  ;;  %s322_s24 = scalar_lea.vmem [#allocation2], %s321_s22  ;;  %s1338_s14 = scalar_lea.sflag [#allocation3], %s321_s22 }
  0x18   : > { %1510 = vmatprep.subr.mxu0 %v1737_v2  ;;  %1521 = vmatprep.subr.mxu1 %v1737_v2  ;;  %v1419_v15 = vld [vmem:[%s2112_s2 + $0x28] sm:$0xff]  ;;  %v513_v16 = vld [vmem:[%s2112_s2] sm:$0xff]  ;;  %v773_v19 = vld [vmem:[%s2113_s3 + $0x18] sm:$0xff]  ;;  %s1350_s25 = sshll.u32 %s322_s24, 4  ;;  %s1351_s25 = int_to_ptr.vmem [resolvable:$true] %s1350_s25 }
  0x19   : > { %1511 = vmatpush3.msra.mxu0 %v329_v5  ;;  %1522 = vmatpush3.msra.mxu1 %v1412_v6  ;;  %v1418_v17 = vld [vmem:[%s2112_s2 + $0x20] sm:$0xff]  ;;  %v1425_v20 = vld [vmem:[%s2112_s2 + $0x50] sm:$0xff]  ;;  %v1424_v22 = vld [vmem:[%s2112_s2 + $0x48] sm:$0xff]  ;;  %s1675_s29 = scalar_lea.vmem %s1351_s25, 16  ;;  %p1682_p0 = scmp.lt.s32.totalorder %s1351_s25, %s1680_s17 }
  0x1a   : > { %1512 = vmatprep.subr.mxu0 %v1737_v2  ;;  %1523 = vmatprep.subr.mxu1 %v1737_v2  ;;  %v772_v21 = vld [vmem:[%s2113_s3 + $0x10] sm:$0xff]  ;;  %v771_v23 = vld [vmem:[%s2113_s3 + $0x8] sm:$0xff]  ;;  %v1423_v24 = vld [vmem:[%s2112_s2 + $0x40] sm:$0xff]  ;;  %p1676_p11 = scmp.ne.s32.totalorder %s1351_s25, %s1675_s29  ;;  %p1683_p1 = scmp.lt.s32.totalorder %s1681_s13, %s1675_s29 }
  0x1b   : > { %1513 = vmatpush3.msra.mxu0 %v328_v7  ;;  %1514 = vmatprep.mubr.msk.f32.mxu0 %vm1738_vm1, %v1737_v2  ;;  %v770_v25 = vld [vmem:[%s2113_s3] sm:$0xff]  ;;  %v1433_v26 = vld [vmem:[%s2113_s3 + $0x38] sm:$0xff]  ;;  %v1432_v27 = vld [vmem:[%s2113_s3 + $0x30] sm:$0xff] }
  0x1c   : > { %1524 = vmatpush3.msra.mxu1 %v1411_v8  ;;  %1525 = vmatprep.mubr.msk.f32.mxu1 %vm1738_vm1, %v1737_v2  ;;  %v1438_v28 = vld [vmem:[%s2113_s3 + $0x58] sm:$0xff]  ;;  %v1431_v29 = vld [vmem:[%s2113_s3 + $0x28] sm:$0xff]  ;;  %v1437_v30 = vld [vmem:[%s2113_s3 + $0x50] sm:$0xff]  ;;  %p1677_p12 = pnand %p1676_p11, %p1828_p5  ;;  %p1684_p2 = por %p1683_p1, %p1682_p0 }
  0x1d   : > { %1515 = vmatmul.mubr.msk.f32.vlgmr.msra.gmra.mxu0 %vm332_vm0, %v1875_v9  ;;  %1526 = vmatmul.mubr.msk.f32.vlgmr.msra.gmra.mxu1 %vm332_vm0, %v1875_v9  ;;  %v1430_v31 = vld [vmem:[%s2113_s3 + $0x20] sm:$0xff]  ;;  %v1436_v32 = vld [vmem:[%s2113_s3 + $0x48] sm:$0xff]  ;;  %v1443_v34 = vld [vmem:[%s2113_s3 + $0x78] sm:$0xff] }
  0x1e   : > { %1528 = vmatprep.subr.mxu0 %v1737_v2  ;;  %1539 = vmatprep.subr.mxu1 %v1737_v2  ;;  %v1435_v33 = vld [vmem:[%s2113_s3 + $0x40] sm:$0xff]  ;;  %v1442_v35 = vld [vmem:[%s2113_s3 + $0x70] sm:$0xff]  ;;  %v1441_v36 = vld [vmem:[%s2113_s3 + $0x68] sm:$0xff]  ;;  %p1678_p13 = pneg %p1677_p12 }
  0x1f   : > { %1529 = vmatpush3.msra.mxu0 %v516_v10  ;;  %1540 = vmatpush3.msra.mxu1 %v1421_v11  ;;  %v1440_v37 = vld [vmem:[%s2113_s3 + $0x60] sm:$0xff]  ;;  %v1104_v38 = vld [vmem:[%s2117_s7 + $0x8] sm:$0xff] }
  0x20   : > { %1530 = vmatprep.subr.mxu0 %v1737_v2  ;;  %1541 = vmatprep.subr.mxu1 %v1737_v2  ;;  %v1103_v39 = vld [vmem:[%s2117_s7] sm:$0xff]  ;;  %v1108_v40 = vld [vmem:[%s2117_s7 + $0x28] sm:$0xff]  ;;  %p1685_p3 = pnand %p1684_p2, %p1678_p13 }
  0x21   : > { %1531 = vmatpush3.msra.mxu0 %v515_v12  ;;  %1542 = vmatpush3.msra.mxu1 %v1420_v13  ;;  %v1107_v41 = vld [vmem:[%s2117_s7 + $0x20] sm:$0xff] }
  0x22   : > { %1532 = vmatprep.subr.mxu0 %v1737_v2  ;;  %1543 = vmatprep.subr.mxu1 %v1737_v2  ;;  %v1416_v45 = vld [vmem:[%s2114_s4] ss:$0 sm:$0xff] }
  0x23   : > { %1533 = vmatpush3.msra.mxu0 %v514_v14  ;;  %1544 = vmatpush3.msra.mxu1 %v1419_v15  ;;  %v1428_v59 = vld [vmem:[%s2115_s5] ss:$0 sm:$0xff] }
  0x24   : > { %1534 = vmatprep.subr.mxu0 %v1737_v2  ;;  %1545 = vmatprep.subr.mxu1 %v1737_v2 }
  0x25   : > { %1535 = vmatpush3.msra.mxu0 %v513_v16  ;;  %1536 = vmatprep.mubr.msk.f32.mxu0 %vm1738_vm1, %v1737_v2 }
  0x26   : > { %1546 = vmatpush3.msra.mxu1 %v1418_v17  ;;  %1547 = vmatprep.mubr.msk.f32.mxu1 %vm1738_vm1, %v1737_v2 }
  0x27   : > { %1537 = vmatmul.mubr.msk.f32.vlgmr.msra.gmra.mxu0 %vm332_vm0, %v1875_v9  ;;  %1548 = vmatmul.mubr.msk.f32.vlgmr.msra.gmra.mxu1 %vm332_vm0, %v1875_v9 }
  0x28   : > { %1550 = vmatprep.subr.mxu0 %v1737_v2  ;;  %1561 = vmatprep.subr.mxu1 %v1737_v2 }
  0x29   : > { %1551 = vmatpush3.msra.mxu0 %v1426_v18  ;;  %1562 = vmatpush3.msra.mxu1 %v773_v19  ;;  %v1106_v19 = vld [vmem:[%s2117_s7 + $0x18] sm:$0xff] }
  0x2a   : > { %1552 = vmatprep.subr.mxu0 %v1737_v2  ;;  %1563 = vmatprep.subr.mxu1 %v1737_v2 }
  0x2b   : > { %1553 = vmatpush3.msra.mxu0 %v1425_v20  ;;  %1564 = vmatpush3.msra.mxu1 %v772_v21 }
  0x2c   : > { %1554 = vmatprep.subr.mxu0 %v1737_v2  ;;  %1565 = vmatprep.subr.mxu1 %v1737_v2 }
  0x2d   : > { %1555 = vmatpush3.msra.mxu0 %v1424_v22  ;;  %1558 = vmatprep.mubr.msk.f32.mxu0 %vm1738_vm1, %v1737_v2  ;;  %v1105_v22 = vld [vmem:[%s2117_s7 + $0x10] sm:$0xff] }
  0x2e   : > { %1556 = vmatprep.subr.mxu0 %v1737_v2  ;;  %1566 = vmatpush3.msra.mxu1 %v771_v23 }
  0x2f   : > { %1557 = vmatpush3.msra.mxu0 %v1423_v24  ;;  %1567 = vmatprep.subr.mxu1 %v1737_v2 }
  0x30   : > { %1559 = vmatmul.mubr.msk.f32.vlgmr.msra.gmra.mxu0 %vm332_vm0, %v1875_v9  ;;  %1572 = vmatprep.subr.mxu0 %v1737_v2 }
  0x31   : > { %1568 = vmatpush3.msra.mxu1 %v770_v25  ;;  %1573 = vmatpush3.msra.mxu0 %v1433_v26 }
  0x32   : > { %1569 = vmatprep.mubr.msk.f32.mxu1 %vm1738_vm1, %v1737_v2  ;;  %1574 = vmatprep.subr.mxu0 %v1737_v2 }
  0x33   : > { %1583 = vmatprep.subr.mxu1 %v1737_v2  ;;  %1570 = vmatmul.mubr.msk.f32.vlgmr.msra.gmra.mxu1 %vm332_vm0, %v1875_v9 }
  0x34   : > { %1575 = vmatpush3.msra.mxu0 %v1432_v27  ;;  %1584 = vmatpush3.msra.mxu1 %v1438_v28  ;;  %v1445_v27 = vld [vmem:[%s2116_s6] ss:$0 sm:$0xff] }
  0x35   : > { %1576 = vmatprep.subr.mxu0 %v1737_v2  ;;  %1585 = vmatprep.subr.mxu1 %v1737_v2 }
  0x36   : > { %1577 = vmatpush3.msra.mxu0 %v1431_v29  ;;  %1586 = vmatpush3.msra.mxu1 %v1437_v30 }
  0x37   : > { %1578 = vmatprep.subr.mxu0 %v1737_v2  ;;  %1587 = vmatprep.subr.mxu1 %v1737_v2 }
  0x38   : > { %1579 = vmatpush3.msra.mxu0 %v1430_v31  ;;  %1580 = vmatprep.mubr.msk.f32.mxu0 %vm1738_vm1, %v1737_v2 }
  0x39   : > { %1588 = vmatpush3.msra.mxu1 %v1436_v32  ;;  %1581 = vmatmul.mubr.msk.f32.vlgmr.msra.gmra.mxu0 %vm332_vm0, %v1875_v9 }
  0x3a   : > { %1589 = vmatprep.subr.mxu1 %v1737_v2  ;;  %1594 = vmatprep.subr.mxu0 %v1737_v2 }
  0x3b   : > { %1590 = vmatpush3.msra.mxu1 %v1435_v33  ;;  %1591 = vmatprep.mubr.msk.f32.mxu1 %vm1738_vm1, %v1737_v2 }
  0x3c   : > { %1595 = vmatpush3.msra.mxu0 %v1443_v34  ;;  %1592 = vmatmul.mubr.msk.f32.vlgmr.msra.gmra.mxu1 %vm332_vm0, %v1875_v9 }
  0x3d   : > { %1596 = vmatprep.subr.mxu0 %v1737_v2  ;;  %1602 = vmatprep.mubr.msk.f32.mxu0 %vm1738_vm1, %v1737_v2 }
  0x3e   : > { %1597 = vmatpush3.msra.mxu0 %v1442_v35  ;;  %1605 = vmatprep.subr.mxu1 %v1737_v2 }
  0x3f   : > { %1598 = vmatprep.subr.mxu0 %v1737_v2  ;;  %1609 = vmatprep.mubr.msk.f32.mxu1 %vm1738_vm1, %v1737_v2 }
  0x40   : > { %1599 = vmatpush3.msra.mxu0 %v1441_v36  ;;  %1606 = vmatpush3.msra.mxu1 %v1104_v38 }
  0x41   : > { %1600 = vmatprep.subr.mxu0 %v1737_v2  ;;  %1607 = vmatprep.subr.mxu1 %v1737_v2 }
  0x42   : > { %1601 = vmatpush3.msra.mxu0 %v1440_v37  ;;  %1608 = vmatpush3.msra.mxu1 %v1103_v39 }
  0x43   : > { %1603 = vmatmul.mubr.msk.f32.vlgmr.msra.gmra.mxu0 %vm332_vm0, %v1875_v9  ;;  %1619 = vmatprep.subr.mxu0 %v1737_v2 }
  0x44   : > { %1623 = vmatprep.mubr.msk.f32.mxu0 %vm1738_vm1, %v1737_v2  ;;  %1612 = vmatprep.subr.mxu1 %v1737_v2 }
  0x45   : > { %1620 = vmatpush3.msra.mxu0 %v1108_v40 }
  0x46   : > { %1621 = vmatprep.subr.mxu0 %v1737_v2 }
  0x47   : > { %1622 = vmatpush3.msra.mxu0 %v1107_v41 }
  0xdd   : > { %v402_v42 = vpop.f32.mrf.mxu0  ;;  %v477_v43 = vpop.f32.mrf.mxu1 }
  0xde   : > { %v482_v44 = vrot.slane %v477_v43, 1 }
  0xdf   : > { %v1516_v46 = vpop.f32.mrf.mxu0  ;;  %v1527_v47 = vpop.f32.mrf.mxu1 }
  0xe0   : > { %v484_v48 = vadd.f32 %v482_v44, %v402_v42 }
  0xe2   : > { %v492_v49 = vadd.f32 %v1416_v45, %v484_v48 }
  0xe4   : > { %1667 = vtanh.f32 %v492_v49 }
  0xe7   : > { %v583_v50 = vpop.f32.mrf.mxu0  ;;  %v658_v51 = vpop.f32.mrf.mxu1 }
  0xe8   : > { %v663_v54 = vrot.slane %v658_v51, 1 }
  0xe9   : > { %v1538_v52 = vpop.f32.mrf.mxu0  ;;  %v1549_v53 = vpop.f32.mrf.mxu1 }
  0xea   : > { %v665_v57 = vadd.f32 %v663_v54, %v583_v50  ;;  %v1109_v53 = vld [vmem:[%s2118_s8] sm:$0x1] }
  0xf0   : > { %v737_v55 = vpop.f32.mrf.mxu0 }
  0xf1   : > { %v1668_v56 = vpop.eup %1667  ;;  %v742_v58 = vrot.slane %v737_v55, 2 }
  0xf2   : > { %v1560_v60 = vpop.f32.mrf.mxu0  ;;  %v495_v61 = vrot.slane %v1668_v56, 1  ;;  %v498_v1 = vrot.slane %v1668_v56, 2  ;;  %v501_v6 = vrot.slane %v1668_v56, 3  ;;  %v504_v8 = vrot.slane %v1668_v56, 4 }
  0xf3   : > { %v744_v62 = vadd.f32 %v742_v58, %v665_v57  ;;  %v840_v63 = vpop.f32.mrf.mxu1  ;;  %v507_v11 = vrot.slane %v1668_v56, 5  ;;  %v510_v16 = vrot.slane %v1668_v56, 6 }
  0xf4   : > { %v497_v0 = vmax.f32 %v1668_v56, %v495_v61 }
  0xf5   : > { %v752_v3 = vadd.f32 %v1428_v59, %v744_v62  ;;  %v1571_v4 = vpop.f32.mrf.mxu1 }
  0xf6   : > { %v500_v5 = vmax.f32 %v497_v0, %v498_v1 }
  0xf7   : > { %1669 = vtanh.f32 %v752_v3 }
  0xf8   : > { %v503_v7 = vmax.f32 %v500_v5, %v501_v6 }
  0xf9   : > { %v915_v9 = vpop.f32.mrf.mxu0 }
  0xfa   : > { %v506_v10 = vmax.f32 %v503_v7, %v504_v8  ;;  %v920_v13 = vrot.slane %v915_v9, 1 }
  0xfb   : > { %v1582_v12 = vpop.f32.mrf.mxu0 }
  0xfc   : > { %v994_v14 = vpop.f32.mrf.mxu1  ;;  %v509_v15 = vmax.f32 %v506_v10, %v507_v11  ;;  %v922_v20 = vadd.f32 %v920_v13, %v840_v63 }
  0xfd   : > { %v999_v21 = vrot.slane %v994_v14, 2 }
  0xfe   : > { %v1593_v17 = vpop.f32.mrf.mxu1  ;;  %v512_v18 = vmax.f32 %v509_v15, %v510_v16 }
  0xff   : > { %v1001_v25 = vadd.f32 %v999_v21, %v922_v20 }
 0x100   : > { %1610 = vmatmul.mubr.msk.f32.vlgmr.msra.gmra.mxu1 %vm1111_vm2, %v512_v18 }
 0x101   : > { %1613 = vmatpush3.msra.mxu1 %v1106_v19  ;;  %1616 = vmatprep.mubr.msk.f32.mxu1 %vm1738_vm1, %v1737_v2 }
 0x102   : > { %1614 = vmatprep.subr.mxu1 %v1737_v2 }
 0x103   : > { %v1073_v23 = vpop.f32.mrf.mxu0  ;;  %1615 = vmatpush3.msra.mxu1 %v1105_v22 }
 0x104   : > { %v1670_v24 = vpop.eup %1669  ;;  %v1078_v26 = vrot.slane %v1073_v23, 3 }
 0x105   : > { %v1604_v28 = vpop.f32.mrf.mxu0  ;;  %v755_v29 = vrot.slane %v1670_v24, 1  ;;  %v758_v32 = vrot.slane %v1670_v24, 2  ;;  %v761_v35 = vrot.slane %v1670_v24, 3  ;;  %v764_v2 = vrot.slane %v1670_v24, 4 }
 0x106   : > { %v1080_v30 = vadd.f32 %v1078_v26, %v1001_v25  ;;  %v767_v38 = vrot.slane %v1670_v24, 5 }
 0x107   : > { %v757_v31 = vmax.f32 %v1670_v24, %v755_v29 }
 0x108   : > { %v1088_v33 = vadd.f32 %v1445_v27, %v1080_v30 }
 0x109   : > { %v760_v34 = vmax.f32 %v757_v31, %v758_v32 }
 0x10a   : > { %1671 = vtanh.f32 %v1088_v33 }
 0x10b   : > { %v763_v36 = vmax.f32 %v760_v34, %v761_v35 }
 0x10d   : > { %v766_v37 = vmax.f32 %v763_v36, %v764_v2 }
 0x10f   : > { %v769_v39 = vmax.f32 %v766_v37, %v767_v38 }
 0x111   : > { %1617 = vmatmul.mubr.msk.f32.vlgmr.msra.gmra.mxu1 %vm1111_vm2, %v769_v39 }
 0x117   : > { %v1672_v40 = vpop.eup %1671 }
 0x118   : > { %v1091_v41 = vrot.slane %v1672_v40, 1  ;;  %v1094_v43 = vrot.slane %v1672_v40, 2  ;;  %v1097_v45 = vrot.slane %v1672_v40, 3  ;;  %v1100_v47 = vrot.slane %v1672_v40, 4 }
 0x11a   : > { %v1093_v42 = vmax.f32 %v1672_v40, %v1091_v41 }
 0x11c   : > { %v1096_v44 = vmax.f32 %v1093_v42, %v1094_v43 }
 0x11e   : > { %v1099_v46 = vmax.f32 %v1096_v44, %v1097_v45 }
 0x120   : > { %v1102_v48 = vmax.f32 %v1099_v46, %v1100_v47 }
 0x122   : > { %1624 = vmatmul.mubr.msk.f32.vlgmr.msra.gmra.mxu0 %vm1111_vm2, %v1102_v48 }
 0x1c0   : > { %v1181_v49 = vpop.f32.mrf.mxu1 }
 0x1c1   : > { %v1185_v54 = vadd.f32 %v1181_v49, %v1109_v53 }
 0x1c2   : > { %v1611_v50 = vpop.f32.mrf.mxu1 }
 0x1d1   : > { %v1255_v51 = vpop.f32.mrf.mxu1 }
 0x1d2   : > { %v1259_v55 = vadd.f32 %v1255_v51, %v1185_v54 }
 0x1d3   : > { %v1618_v52 = vpop.f32.mrf.mxu1 }
 0x1e2   : > { %v1329_v56 = vpop.f32.mrf.mxu0 }
 0x1e3   : > { %v1333_v57 = vadd.f32 %v1329_v56, %v1259_v55 }
 0x1e4   : > { %v1625_v58 = vpop.f32.mrf.mxu0 }
 0x1e5   : > { %1673 = vtanh.f32 %v1333_v57 }
 0x1f2   : > { %v1674_v59 = vpop.eup %1673 }
 0x1f3   : > { %1336 = vst.msk [vmem:[%s322_s24] sm:$0x1] %vm1335_vm3, %v1674_v59 }
 0x1f4   : > { %1688 = shalt.err (!%p1685_p3)
}
 0x1f5   : > { %s1689_s21 = scalar_lea.hbm %s2075_s28, 16  ;;  %s1693_s24 = scalar_lea.hbm %s2119_s9, 32 }
 0x1f6   : > { %p1690_p4 = scmp.ne.s32.totalorder %s2075_s28, %s1689_s21  ;;  %p1694_p9 = scmp.lt.s32.totalorder %s2075_s28, %s2119_s9 }
 0x1f7   : > { %p1695_p10 = scmp.lt.s32.totalorder %s1693_s24, %s1689_s21 }
 0x1f8   : > { %p1691_p7 = pnand %p1690_p4, %p1828_p5 }
 0x1f9   : > { %p1696_p11 = por %p1695_p10, %p1694_p9 }
 0x1fa   : > { %p1692_p8 = pneg %p1691_p7 }
 0x1fc   : > { %p1697_p12 = pnand %p1696_p11, %p1692_p8 }
 0x1fe   : > { %1700 = shalt.err (!%p1697_p12)
}
 0x1ff   : > { %1626 = dma.vmem_to_hbm [thread:$0]  (%p1828_p5), %s1351_s25, 16, %s2075_s28, %s1338_s14  }
 0x200 PF: > { %p1632_p13 = scmp.ge.s32.totalorder %s1735_s12, 2  ;;  %s1362_s29 = sand.u32 1, %s1723_s30  }
 0x201   : > { %s1363_s16 = scalar_lea.sflag [#allocation3], %s1362_s29 }
 0x202   : > { %p1629_p0 = pnand %p1632_p13, %p1832_p6 }
 0x204   : > { %p1630_p1 = pneg %p1629_p0 }
 0x206   : > { %1718 = dma.done.wait (%p1630_p1), %s1363_s16, 16  }
 0x207   : > { %1720 = vsyncadd (%p1630_p1), %s1363_s16, 4294967280  ;;  %p19_p2 = scmp.ge.s32.totalorder %s1815_s15, 4   ;;  %s2122_s30 = smov %s1727_s10 }
 0x208   : > { %s2123_s10 = smov %s1731_s11  ;;  %s2124_s11 = smov %s1826_s18 }
 0x209   : > { %s2125_s12 = smov %s1815_s15  ;;  %21 = sbr.rel (!%p19_p2) target bundleno = 3 (0x3), region = 97 }
 0x20e   :  { %1367 = vsyncpa [#allocation3], 1 }
 0x20f   :  { %1369 = vsyncpa [#allocation3 + $0x1], 1 }

</bundles_post_ra>
